<compile_context>
chip_gen: v7x
topology: tpu7x:2x2x1
jax: 0.10.0
libtpu: 0.0.40
codegen_flags: <defaults>
</compile_context>

<pallas_src>
import numpy as np
import jax
import jax.numpy as jnp
from jax.experimental import pallas as pl
from jax.experimental.pallas import tpu as pltpu

# ---------------- config (small shapes consistent with the torch module) ----------------
BATCH      = 2
SEQ_LEN    = 64
PRED_LEN   = 16
ENC_IN     = 4
WINDOW     = 256                       # HiPPO order N (window_size=[256] in the module)
MULTISCALE = (1, 2, 4)
MODES      = min(32, min(PRED_LEN, SEQ_LEN) // 2)   # SpectralConv1d modes (same for all scales)
assert SEQ_LEN >= PRED_LEN                           # seq_len >= pred_len branch (jump_dist = 0)
assert SEQ_LEN >= MULTISCALE[-1] * PRED_LEN          # largest window fits inside the history


# ---------------- host-side parameter construction (plain numpy / JAX glue) --------------
def transition(N):
    Q = np.arange(N, dtype=np.float64)
    R = (2 * Q + 1)[:, None]
    j, i = np.meshgrid(Q, Q)
    A = np.where(i < j, -1, (-1.0) ** (i - j + 1)) * R
    B = (-1.0) ** Q[:, None] * R
    return A, B


def cont2discrete_bilinear(A, B, dt):
    # scipy.signal.cont2discrete(..., method='bilinear') for the (A, B) part.
    n = A.shape[0]
    I = np.eye(n)
    ima = I - 0.5 * dt * A
    Ad = np.linalg.solve(ima, I + 0.5 * dt * A)
    Bd = np.linalg.solve(ima, dt * B)
    return Ad, Bd


def legendre_vandermonde(N, x):
    # [len(x), N] matrix of Legendre polynomials P_n(x) (== ss.eval_legendre(...).T).
    x = np.asarray(x, np.float64)
    out = np.zeros((x.shape[0], N), np.float64)
    out[:, 0] = 1.0
    if N > 1:
        out[:, 1] = x
    for n in range(1, N - 1):
        out[:, n + 1] = ((2 * n + 1) * x * out[:, n] - n * out[:, n - 1]) / (n + 1)
    return out


def build_model_params(seed=0):
    """Builds the fully fused forward operator W_total ([SEQ_LEN, PRED_LEN], float64 fold,
    stored f32) plus the raw float32 buffers used by the numpy reference."""
    N, P, K, S = WINDOW, PRED_LEN, MODES, SEQ_LEN
    keys = jax.random.split(jax.random.PRNGKey(seed), 2 * len(MULTISCALE) + 2)
    w_scale = 1.0 / (N * N)
    W_scale_list, ref_scales = [], []
    for si, m in enumerate(MULTISCALE):
        L = m * P
        dt = 1.0 / P / m
        A, B = transition(N)
        Ad, Bd = cont2discrete_bilinear(A, B, dt)
        Ad32 = Ad.astype(np.float32)                       # torch buffers are float32
        Bd32 = Bd.squeeze(-1).astype(np.float32)
        vals = np.arange(0.0, 1.0, dt)
        EM = legendre_vandermonde(N, 1.0 - 2.0 * vals).astype(np.float32)   # [len(vals), N]
        evalT = np.ascontiguousarray(EM[-P:, :].T)                          # [N, P]

        Wr = np.asarray(w_scale * jax.random.uniform(keys[2 * si], (N, N, K)), np.float32)
        Wi = np.asarray(w_scale * jax.random.uniform(keys[2 * si + 1], (N, N, K)), np.float32)

        # ---- fused recurrence + rfft operator H (float64 math on the f32-cast buffers) ----
        AdT64 = Ad32.astype(np.float64).T                  # c @ A^T  ==  c @ AdT64
        Bv64 = Bd32.astype(np.float64)                     # [N]
        G = np.zeros((L, N), np.float64)                   # G[j] = B_d (A_d^T)^j
        g = Bv64.copy()
        for j in range(L):
            G[j] = g
            g = g @ AdT64
        t = np.arange(L)
        kk = np.arange(K)
        ang = 2.0 * np.pi * np.outer(kk, t) / L
        cos_tab = np.cos(ang)                              # [K, L]
        nsin_tab = -np.sin(ang)
        Hr = np.zeros((K, L, N), np.float64)
        Hi = np.zeros((K, L, N), np.float64)
        for s in range(L):                                 # Hr[k,s,:] = sum_{t>=s} cos[k,t] G[t-s]
            Hr[:, s, :] = cos_tab[:, s:] @ G[:L - s]
            Hi[:, s, :] = nsin_tab[:, s:] @ G[:L - s]
        Hkn = np.stack([Hr, Hi], axis=1).reshape(2 * K, L, N)        # [Hr_0,Hi_0,Hr_1,Hi_1,...]
        H = np.transpose(Hkn, (1, 0, 2)).reshape(L, 2 * K * N)       # [L, 2K*N]

        # ---- fused spectral weights U: fold irfft-at-t* coefficients and evalT -----------
        # irfft evaluated at t* = pred_len - 1 (jump_dist = 0, seq_len >= pred_len branch).
        # irfft ignores Im of the DC bin; Nyquist bin is always zero since K <= L//2.
        tstar = P - 1
        th = 2.0 * np.pi * kk * tstar / L
        alphas = np.where(kk == 0, 1.0, 2.0) * np.cos(th) / L
        betas = -np.where(kk == 0, 0.0, 2.0) * np.sin(th) / L
        Wr64 = Wr.astype(np.float64)                       # [N_in, N_out, K]
        Wi64 = Wi.astype(np.float64)
        U = np.zeros((2 * K, N, N), np.float64)
        for k in range(K):
            U[2 * k] = alphas[k] * Wr64[:, :, k] + betas[k] * Wi64[:, :, k]
            U[2 * k + 1] = betas[k] * Wr64[:, :, k] - alphas[k] * Wi64[:, :, k]
        Ufull = U.reshape(2 * K * N, N) @ evalT.astype(np.float64)   # [2K*N, P]

        # ---- per-scale fully fused operator: out_s = x_lastL @ (H @ U)  -------------------
        W_scale_list.append(H @ Ufull)                                # [L, P] float64
        ref_scales.append(dict(L=L, Ad32=Ad32, Bd32=Bd32, evalT32=evalT, Wr=Wr, Wi=Wi))

    bound = 1.0 / np.sqrt(len(MULTISCALE))
    mlp_w = np.asarray(jax.random.uniform(keys[-2], (len(MULTISCALE),),
                                          minval=-bound, maxval=bound), np.float32)
    mlp_b = float(jax.random.uniform(keys[-1], (), minval=-bound, maxval=bound))

    # ---- bake "last L samples" window alignment + nn.Linear(3,1) scale mix into one W ----
    W_total = np.zeros((S, P), np.float64)
    for si, m in enumerate(MULTISCALE):
        L = m * P
        W_total[S - L:, :] += float(mlp_w[si]) * W_scale_list[si]

    # NOTE: affine_weight / affine_bias exist in __init__ but are unused in Model.forward.
    params = dict(
        wt=jnp.asarray(W_total.T.astype(np.float32)),        # [P, S] fused operator (f32)
        bias=jnp.asarray(np.array([mlp_b], np.float32)),     # [1]    mlp bias
    )
    return params, ref_scales, mlp_w, mlp_b


# ---------------- Pallas kernel: single invocation, one tiny MXU dot per batch row -------
def _film_kernel(x_ref, wt_ref, bias_ref, out_ref):
    # x_ref   : [B, S, E] f32  raw encoder input (no wrapper-side slicing/transpose/pad)
    # wt_ref  : [P, S]    f32  fully fused forward operator (recurrence+rfft+spectral+irfft
    #                          +Legendre decode+window alignment+scale mix), transposed
    # bias_ref: [1]       f32  mlp bias (SMEM scalar)
    # out_ref : [B, P, E] f32  written directly in [batch, pred_len, enc_in] layout
    bias = bias_ref[0]
    wt = wt_ref[...]
    for b in range(out_ref.shape[0]):                         # B is tiny & static -> unrolled
        out_ref[b] = jnp.dot(wt, x_ref[b],
                             preferred_element_type=jnp.float32) + bias


def film_forward(x_enc, wt, bias):
    Bsz, S, E = x_enc.shape
    P = wt.shape[0]
    cost = pl.CostEstimate(
        flops=2 * Bsz * P * S * E,
        transcendentals=0,
        bytes_accessed=4 * (Bsz * S * E + P * S + Bsz * P * E + 1),
    )
    return pl.pallas_call(
        _film_kernel,
        out_shape=jax.ShapeDtypeStruct((Bsz, P, E), jnp.float32),
        in_specs=[
            pl.BlockSpec(memory_space=pltpu.MemorySpace.VMEM),   # x_enc (full array)
            pl.BlockSpec(memory_space=pltpu.MemorySpace.VMEM),   # fused weight (full array)
            pl.BlockSpec(memory_space=pltpu.MemorySpace.SMEM),   # scalar bias
        ],
        out_specs=pl.BlockSpec(memory_space=pltpu.MemorySpace.VMEM),
        cost_estimate=cost,
    )(x_enc, wt, bias)


# ---------------- full model forward: just the single pallas_call ------------------------
def model_forward(x_enc, params):
    return film_forward(x_enc, params["wt"], params["bias"])   # [B, pred_len, enc_in]


# ---------------- pure numpy reference (mirrors the torch forward, float64) --------------
def reference_forward(x_enc, scales, mlp_w, mlp_b):
    x = np.asarray(x_enc, np.float64)
    Bsz, S, E = x.shape
    P, K = PRED_LEN, MODES
    outs = []
    for sc in scales:
        L = sc["L"]
        Ad = sc["Ad32"].astype(np.float64)
        Bd = sc["Bd32"].astype(np.float64)
        evalT = sc["evalT32"].astype(np.float64)
        Wr = sc["Wr"].astype(np.float64)       # [N_in, N_out, K]
        Wi = sc["Wi"].astype(np.float64)
        N = Ad.shape[0]
        x_in = x[:, -L:, :]
        xt = np.transpose(x_in, (0, 2, 1))      # [B, E, L]
        c = np.zeros((Bsz, E, N))
        cs = []
        for t in range(L):
            f = xt[:, :, t:t + 1]
            c = c @ Ad.T + f * Bd[None, None, :]
            cs.append(c)
        cs = np.stack(cs, axis=0)               # [L, B, E, N]
        xc = np.transpose(cs, (1, 2, 3, 0))     # [B, E, N, L]
        xft = np.fft.rfft(xc, axis=-1)
        a = xft[..., :K]
        out_ft = np.zeros(xc.shape[:3] + (L // 2 + 1,), dtype=np.complex128)
        out_re = np.einsum('bjix,iox->bjox', a.real, Wr) - np.einsum('bjix,iox->bjox', a.imag, Wi)
        out_im = np.einsum('bjix,iox->bjox', a.real, Wi) + np.einsum('bjix,iox->bjox', a.imag, Wr)
        out_ft[..., :K] = out_re + 1j * out_im
        xr = np.fft.irfft(out_ft, n=L, axis=-1)  # [B, E, N, L]
        x_dec_c = xr[:, :, :, P - 1]             # [B, E, N]
        outs.append(x_dec_c @ evalT)             # [B, E, P]
    st = np.stack(outs, axis=-1)                 # [B, E, P, n_scales]
    y = st @ np.asarray(mlp_w, np.float64) + float(mlp_b)
    return np.transpose(y, (0, 2, 1))            # [B, pred_len, enc_in]


if __name__ == "__main__":
    params, ref_scales, mlp_w, mlp_b = build_model_params(seed=0)

    key = jax.random.PRNGKey(0)
    x_enc = jax.random.normal(key, (BATCH, SEQ_LEN, ENC_IN), dtype=jnp.float32)

    fwd = jax.jit(lambda x: model_forward(x, params))
    out = jax.block_until_ready(fwd(x_enc))
    assert out.shape == (BATCH, PRED_LEN, ENC_IN), out.shape

    ref = reference_forward(np.asarray(x_enc), ref_scales, mlp_w, mlp_b)
    rel_err = np.max(np.abs(np.asarray(out, np.float64) - ref)) / (np.max(np.abs(ref)) + 1e-12)
    # float64 offline fold + f32 in-kernel matmul; typically ~1e-5, gate kept conservative.
    assert rel_err < 2e-2, f"kernel vs reference max relative error too large: {rel_err}"

    print("KERNEL_OK")
</pallas_src>

<mosaic_0001>
module attributes {stable_mosaic.version = 11 : i64} {
  func.func @_film_kernel(%arg0: memref<2x64x4xf32, #tpu.memory_space<vmem>>, %arg1: memref<16x64xf32, #tpu.memory_space<vmem>>, %arg2: memref<1xf32, #tpu.memory_space<smem>>, %arg3: memref<2x16x4xf32, #tpu.memory_space<vmem>>) attributes {dimension_semantics = [], scalar_prefetch = 0 : i64, scratch_operands = 0 : i64, tpu.core_type = #tpu.core_type<tc>} {
    %c0 = arith.constant 0 : index
    %0 = memref.load %arg2[%c0] : memref<1xf32, #tpu.memory_space<smem>>
    %c0_0 = arith.constant 0 : index
    %c0_1 = arith.constant 0 : index
    %1 = vector.load %arg1[%c0_0, %c0_1] : memref<16x64xf32, #tpu.memory_space<vmem>>, vector<16x64xf32>
    %c0_2 = arith.constant 0 : index
    %c0_3 = arith.constant 0 : index
    %c0_4 = arith.constant 0 : index
    %2 = vector.load %arg0[%c0_2, %c0_3, %c0_4] : memref<2x64x4xf32, #tpu.memory_space<vmem>>, vector<1x64x4xf32>
    %3 = vector.shape_cast %2 : vector<1x64x4xf32> to vector<64x4xf32>
    %cst = arith.constant dense<0.000000e+00> : vector<16x4xf32>
    %4 = tpu.matmul %1, %3, %cst {dimension_numbers = #tpu.dot_dimension_numbers<[1], [0], [0], [1], [0, 0, 1, 1], [], []>} : vector<16x64xf32>, vector<64x4xf32>, vector<16x4xf32> -> vector<16x4xf32>
    %5 = vector.broadcast %0 : f32 to vector<16x4xf32>
    %6 = arith.addf %4, %5 : vector<16x4xf32>
    %c0_5 = arith.constant 0 : index
    %c0_6 = arith.constant 0 : index
    %c0_7 = arith.constant 0 : index
    %7 = vector.load %arg3[%c0_5, %c0_6, %c0_7] : memref<2x16x4xf32, #tpu.memory_space<vmem>>, vector<1x16x4xf32>
    %8 = vector.shape_cast %7 : vector<1x16x4xf32> to vector<16x4xf32>
    %9 = vector.shape_cast %6 : vector<16x4xf32> to vector<1x16x4xf32>
    tpu.vector_store %arg3[%c0_5, %c0_6, %c0_7], %9 {strides = array<i32>} : memref<2x16x4xf32, #tpu.memory_space<vmem>>, vector<1x16x4xf32>,
    %c1 = arith.constant 1 : index
    %c0_8 = arith.constant 0 : index
    %c0_9 = arith.constant 0 : index
    %10 = vector.load %arg0[%c1, %c0_8, %c0_9] : memref<2x64x4xf32, #tpu.memory_space<vmem>>, vector<1x64x4xf32>
    %11 = vector.shape_cast %10 : vector<1x64x4xf32> to vector<64x4xf32>
    %cst_10 = arith.constant dense<0.000000e+00> : vector<16x4xf32>
    %12 = tpu.matmul %1, %11, %cst_10 {dimension_numbers = #tpu.dot_dimension_numbers<[1], [0], [0], [1], [0, 0, 1, 1], [], []>} : vector<16x64xf32>, vector<64x4xf32>, vector<16x4xf32> -> vector<16x4xf32>
    %13 = vector.broadcast %0 : f32 to vector<16x4xf32>
    %14 = arith.addf %12, %13 : vector<16x4xf32>
    %c1_11 = arith.constant 1 : index
    %c0_12 = arith.constant 0 : index
    %c0_13 = arith.constant 0 : index
    %15 = vector.load %arg3[%c1_11, %c0_12, %c0_13] : memref<2x16x4xf32, #tpu.memory_space<vmem>>, vector<1x16x4xf32>
    %16 = vector.shape_cast %15 : vector<1x16x4xf32> to vector<16x4xf32>
    %17 = vector.shape_cast %14 : vector<16x4xf32> to vector<1x16x4xf32>
    tpu.vector_store %arg3[%c1_11, %c0_12, %c0_13], %17 {strides = array<i32>} : memref<2x16x4xf32, #tpu.memory_space<vmem>>, vector<1x16x4xf32>,
    return
  }
}

</mosaic_0001>

<bundles_post_ra>
// kernel: _lambda_.1
= control target key start
LH: loop header
LB: loop body
LE: loop exit
PB: predicated region body
PF: predicated region fallthrough
CT: control target
= control target key end

     0   :  { %vm27_vm0 = vcmask 523264   ;;  %vm109_vm1 = vcmask 31744   ;;  %s400_s0 = inlined_call_operand.vmem [shape: f32[2,64,4], index: 0, kind: input, shape index: {}]   ;;  %s401_s1 = inlined_call_operand.vmem [shape: f32[16,64], index: 1, kind: input, shape index: {}]   ;;  %s402_s2 = inlined_call_operand.<no memory space> [shape: f32[1], index: 2, kind: input, shape index: {}]   ;;  %s403_s3 = inlined_call_operand.vmem [shape: f32[2,16,4], index: 3, kind: output, shape index: {}]  }
   0x1   :  { %v18_v0 = vld [vmem:[%s400_s0] sm:$0xff]  ;;  %v19_v1 = vld [vmem:[%s400_s0 + $0x8] sm:$0xff]  ;;  %v20_v5 = vld [vmem:[%s400_s0 + $0x10] sm:$0xff]  ;;  %v26_v26 = vstv %s402_s2 }
   0x2   :  { %v205_v2 = vld [vmem:[%s400_s0 + $0x40] sm:$0xff]  ;;  %v275_v3 = vpack.c.bf16 %v19_v1, %v18_v0  ;;  %v206_v4 = vld [vmem:[%s400_s0 + $0x48] sm:$0xff]  ;;  %v21_v6 = vld [vmem:[%s400_s0 + $0x18] sm:$0xff] }
   0x3   :  { %v291_v7 = vpack.c.bf16 %v206_v4, %v205_v2  ;;  %v279_v8 = vpack.c.bf16 %v21_v6, %v20_v5  ;;  %v207_v9 = vld [vmem:[%s400_s0 + $0x50] sm:$0xff]  ;;  %v208_v10 = vld [vmem:[%s400_s0 + $0x58] sm:$0xff]  ;;  %v22_v11 = vld [vmem:[%s400_s0 + $0x20] sm:$0xff] }
   0x4   :  { %276 = vmatprep.subr.bf16.mxu0 %v275_v3  ;;  %v295_v12 = vpack.c.bf16 %v208_v10, %v207_v9  ;;  %v23_v13 = vld [vmem:[%s400_s0 + $0x28] sm:$0xff]  ;;  %v209_v14 = vld [vmem:[%s400_s0 + $0x60] sm:$0xff]  ;;  %v24_v19 = vld [vmem:[%s400_s0 + $0x30] sm:$0xff] }
   0x5   :  { %v210_v15 = vld [vmem:[%s400_s0 + $0x68] sm:$0xff]  ;;  %292 = vmatprep.subr.bf16.mxu1 %v291_v7  ;;  %278 = vmatpush3.bf16.msra.mxu0 %v275_v3  ;;  %v283_v16 = vpack.c.bf16 %v23_v13, %v22_v11  ;;  %v16_v17 = vld [vmem:[%s401_s1] sm:$0xff]  ;;  %v25_v20 = vld [vmem:[%s400_s0 + $0x38] sm:$0xff] }
   0x6   :  { %294 = vmatpush3.bf16.msra.mxu1 %v291_v7  ;;  %280 = vmatprep.subr.bf16.mxu0 %v279_v8  ;;  %v299_v18 = vpack.c.bf16 %v210_v15, %v209_v14  ;;  %v211_v21 = vld [vmem:[%s400_s0 + $0x70] sm:$0xff]  ;;  %v212_v22 = vld [vmem:[%s400_s0 + $0x78] sm:$0xff]  ;;  %v287_v23 = vpack.c.bf16 %v25_v20, %v24_v19  ;;  %v17_v25 = vld [vmem:[%s401_s1 + $0x8] sm:$0xff] }
   0x7   :  { %296 = vmatprep.subr.bf16.mxu1 %v295_v12  ;;  %253 = vmatprep.mubr.msk.f32.mxu0 %vm27_vm0, %v16_v17  ;;  %v303_v24 = vpack.c.bf16 %v212_v22, %v211_v21 }
   0x8   :  { %272 = vmatprep.mubr.msk.f32.mxu1 %vm27_vm0, %v16_v17 }
   0x9   :  { %282 = vmatpush3.bf16.msra.mxu0 %v279_v8 }
   0xa   :  { %298 = vmatpush3.bf16.msra.mxu1 %v295_v12  ;;  %284 = vmatprep.subr.bf16.mxu0 %v283_v16 }
   0xb   :  { %300 = vmatprep.subr.bf16.mxu1 %v299_v18 }
   0xd   :  { %286 = vmatpush3.bf16.msra.mxu0 %v283_v16 }
   0xe   :  { %302 = vmatpush3.bf16.msra.mxu1 %v299_v18  ;;  %288 = vmatprep.subr.bf16.mxu0 %v287_v23 }
   0xf   :  { %304 = vmatprep.subr.bf16.mxu1 %v303_v24 }
  0x11   :  { %290 = vmatpush3.bf16.msra.mxu0 %v287_v23 }
  0x12   :  { %306 = vmatpush3.bf16.msra.mxu1 %v303_v24 }
  0x14   :  { %254 = vmatmul.mubr.msk.f32.vlgmr.msra.gmra.mrb[0].mxu0 %vm27_vm0, %v17_v25 }
  0x15   :  { %273 = vmatmul.mubr.msk.f32.vlgmr.msra.gmra.mrb[0].mxu1 %vm27_vm0, %v17_v25 }
  0xe7   :  { %v255_v27 = vpop.f32.mrb[0].mxu0 }
  0xe8   :  { %v106_v28 = vadd.f32 %v255_v27, %v26_v26  ;;  %v274_v29 = vpop.f32.mrb[0].mxu1  ;;  %v100_v30 = vpop.f32.mrb[1].mxu0 }
  0xe9   :  { %v193_v31 = vadd.f32 %v274_v29, %v26_v26  ;;  %v101_v32 = vadd.f32 %v100_v30, %v26_v26  ;;  %v187_v33 = vpop.f32.mrb[1].mxu1 }
  0xea   :  { %111 = vst.msk [vmem:[%s403_s3 + $0x8] sm:$0xff] %vm109_vm1, %v106_v28  ;;  %v188_v34 = vadd.f32 %v187_v33, %v26_v26 }
  0xeb   :  { %216 = vst.msk [vmem:[%s403_s3 + $0x18] sm:$0xff] %vm109_vm1, %v193_v31  ;;  %110 = vst.msk [vmem:[%s403_s3] sm:$0xff] %vm109_vm1, %v101_v32 }
  0xec   :  { %215 = vst.msk [vmem:[%s403_s3 + $0x10] sm:$0xff] %vm109_vm1, %v188_v34 }

</bundles_post_ra>
